<compile_context>
chip_gen: v7x
topology: tpu7x:2x2x1
jax: 0.10.0
libtpu: 0.0.40
codegen_flags: <defaults>
</compile_context>

<pallas_src>
import functools

import jax
import jax.numpy as jnp
from jax.experimental import pallas as pl
from jax.experimental.pallas import tpu as pltpu


def _round_up(x, m):
    return ((x + m - 1) // m) * m


def _vmem_capacity_bytes():
    try:
        return int(pltpu.get_tpu_info().vmem_capacity_bytes)
    except Exception:
        return 64 * 1024 * 1024  # conservative (v7x physical VMEM per TC)


def _center_sums_kernel(x_ref, t_ref, sums_ref, cnt_ref, *,
                        num_classes, tile, n_chunks, tiles_per_chunk, rem):
    # x_ref:    (1, C_emb, TILE)       embeddings (native dtype, NOT upcast)
    # t_ref:    (1, 1, TILE)           int32 class ids
    # sums_ref: (1, 1, NC, C_emb)      per-(sample, chunk) masked sums (accum)
    # cnt_ref:  (1, 1, NC, 1)          per-(sample, chunk) pixel counts (accum)
    c = pl.program_id(1)   # spatial chunk (parallel)
    j = pl.program_id(2)   # tile within chunk (arbitrary / reduction)

    @pl.when(j == 0)
    def _():
        sums_ref[...] = jnp.zeros_like(sums_ref)
        cnt_ref[...] = jnp.zeros_like(cnt_ref)

    t = t_ref[0]                                                   # (1, TILE)
    cls = jax.lax.broadcasted_iota(jnp.int32, (num_classes, tile), 0)
    base_mask = (t == cls)                                         # bool (NC, TILE)

    def accumulate(x, cls_mask_bool):
        # Mask in the native dtype of x (0/1 is exact in bf16); MXU accumulates f32.
        mask = cls_mask_bool.astype(x.dtype)
        s_part = jax.lax.dot_general(
            mask, x, (((1,), (1,)), ((), ())),
            preferred_element_type=jnp.float32)                    # (NC, C_emb)
        c_part = jnp.sum(cls_mask_bool.astype(jnp.float32),
                         axis=1, keepdims=True)                    # (NC, 1)
        sums_ref[0, 0] += s_part
        cnt_ref[0, 0] += c_part

    if rem == 0:
        # Fast path: every tile is full — no masking cost at all.
        accumulate(x_ref[0], base_mask)
    else:
        # Only the globally-last tile is ragged; pay the lane-mask select there
        # only.  Do NOT rely on mask*garbage == 0 — stale VMEM may hold NaN/Inf.
        is_last = jnp.logical_and(c == n_chunks - 1, j == tiles_per_chunk - 1)

        @pl.when(jnp.logical_not(is_last))
        def _():
            accumulate(x_ref[0], base_mask)

        @pl.when(is_last)
        def _():
            lane = jax.lax.broadcasted_iota(jnp.int32, (1, tile), 1)
            valid = lane < rem                                     # (1, TILE)
            x = jnp.where(valid, x_ref[0], 0)
            accumulate(x, jnp.logical_and(base_mask, valid))


def al2_loss_2d(inputs, targets, num_classes, *,
                tile_hw=None, target_block_bytes=4 << 20, compute_dtype=None):
    """inputs: (N, C_emb, H, W) embeddings; targets: (N, H, W) integer class ids."""
    n, c_emb, h, w = inputs.shape
    hw = h * w

    x = inputs.reshape(n, c_emb, hw)
    if compute_dtype is not None and compute_dtype != x.dtype:
        # Optional bf16 streaming path (caller opt-in); never upcast here.
        x = x.astype(compute_dtype)
    # TODO(synk): for very small C_emb, int8 targets would cut target HBM bytes ~4x.
    t = targets.reshape(n, 1, hw).astype(jnp.int32)

    dtype_bytes = jnp.dtype(x.dtype).itemsize

    # ---- Tile sizing: by bytes, not lanes (≈4 MB per x block). ----
    if tile_hw is None:
        tile = (target_block_bytes // max(1, c_emb * dtype_bytes)) // 128 * 128
        tile = max(128, min(tile, 65536))
    else:
        tile = max(128, _round_up(tile_hw, 128))
    tile = min(tile, _round_up(hw, 128))

    num_tiles = pl.cdiv(hw, tile)
    rem = hw % tile                       # valid lanes in the ragged last tile (0 = none)

    # Coarse spatial-chunk axis so both v7x TensorCores get work at small N.
    n_chunks = 2 if (num_tiles >= 2 and num_tiles % 2 == 0) else 1
    tiles_per_chunk = num_tiles // n_chunks

    # ---- VMEM budget (generation-aware). ----
    x_block = c_emb * tile * dtype_bytes
    t_block = tile * 4
    out_block = num_classes * (c_emb + 1) * 4
    scratch = num_classes * tile * (dtype_bytes + 4) + (4 << 20)
    needed = 2 * (x_block + t_block) + 2 * out_block + scratch
    cap = _vmem_capacity_bytes()
    vmem_limit = int(min(max(needed, 32 << 20), (cap * 3) // 4))

    grid = (n, n_chunks, tiles_per_chunk)

    cost = pl.CostEstimate(
        flops=int(2 * num_classes * c_emb * n * hw),
        transcendentals=0,
        bytes_accessed=int(n * c_emb * hw * dtype_bytes + n * hw * 4
                           + n * n_chunks * num_classes * (c_emb + 1) * 4),
    )

    kernel = functools.partial(
        _center_sums_kernel,
        num_classes=num_classes, tile=tile,
        n_chunks=n_chunks, tiles_per_chunk=tiles_per_chunk, rem=rem)

    sums, cnts = pl.pallas_call(
        kernel,
        out_shape=(
            jax.ShapeDtypeStruct((n, n_chunks, num_classes, c_emb), jnp.float32),
            jax.ShapeDtypeStruct((n, n_chunks, num_classes, 1), jnp.float32),
        ),
        grid=grid,
        in_specs=[
            pl.BlockSpec((1, c_emb, tile),
                         lambda i, c, j: (i, 0, c * tiles_per_chunk + j)),
            pl.BlockSpec((1, 1, tile),
                         lambda i, c, j: (i, 0, c * tiles_per_chunk + j)),
        ],
        out_specs=(
            pl.BlockSpec((1, 1, num_classes, c_emb), lambda i, c, j: (i, c, 0, 0)),
            pl.BlockSpec((1, 1, num_classes, 1), lambda i, c, j: (i, c, 0, 0)),
        ),
        compiler_params=pltpu.CompilerParams(
            dimension_semantics=("parallel", "parallel", "arbitrary"),
            vmem_limit_bytes=vmem_limit,
        ),
        cost_estimate=cost,
    )(x, t)

    # --- Tiny finalize (O(num_classes^2 * C_emb)) in plain JAX. ---
    s = jnp.sum(sums, axis=(0, 1))                  # (NC, C_emb) masked sums
    p = jnp.sum(cnts, axis=(0, 1))[:, 0]            # (NC,)       pixel counts
    centers = s / jnp.maximum(p, 1.0)[:, None]      # (NC, C_emb)

    # CosineEmbeddingLoss(margin=0, mean reduction) between all centers and
    # center_i, label +1 on the diagonal and -1 elsewhere.
    # (eps handling: PyTorch clamps each norm separately; clamping the product
    #  is equivalent here — an absent class gives an all-zero center, cos=0.)
    norms = jnp.sqrt(jnp.sum(centers * centers, axis=1))            # (NC,)
    gram = centers @ centers.T                                      # (NC, NC)
    cos = gram / jnp.maximum(norms[:, None] * norms[None, :], 1e-8)
    eye = jnp.eye(num_classes, dtype=jnp.float32)
    per_pair = eye * (1.0 - cos) + (1.0 - eye) * jnp.maximum(cos, 0.0)
    embedding_loss = jnp.sum(per_pair) / num_classes                # sum_i mean_j
    return embedding_loss / (num_classes * num_classes)


def _reference_loss(inputs, targets, num_classes):
    """Pure-JAX mirror of the PyTorch AL2Loss2d.forward."""
    n, c_emb, h, w = inputs.shape
    x = inputs.astype(jnp.float32).transpose(1, 0, 2, 3).reshape(c_emb, -1)  # (C, N*H*W)
    t = targets.reshape(-1)
    centers = []
    for i in range(num_classes):
        mask = (t == i).astype(jnp.float32)
        sum_pixel = jnp.maximum(jnp.sum(mask), 1.0)
        centers.append(jnp.sum(x * mask[None, :], axis=1) / sum_pixel)
    total = jnp.float32(0.0)
    for i in range(num_classes):
        ci = centers[i]
        losses = []
        for j in range(num_classes):
            cj = centers[j]
            cosv = jnp.dot(cj, ci) / jnp.maximum(
                jnp.linalg.norm(cj) * jnp.linalg.norm(ci), 1e-8)
            if j == i:
                losses.append(1.0 - cosv)
            else:
                losses.append(jnp.maximum(cosv, 0.0))
        total = total + jnp.mean(jnp.stack(losses))
    return total / (num_classes * num_classes)


if __name__ == "__main__":
    key = jax.random.PRNGKey(0)

    def check(inputs, targets, nc, **kw):
        loss = jax.block_until_ready(al2_loss_2d(inputs, targets, nc, **kw))
        ref = jax.block_until_ready(_reference_loss(inputs, targets, nc))
        assert jnp.allclose(loss, ref, rtol=1e-5, atol=1e-5), (loss, ref)

    # Case 1: small shape from the module spec (batch=2, channels=4, spatial=16).
    k_x, k_t, key = jax.random.split(key, 3)
    inputs = jax.random.normal(k_x, (2, 4, 16, 16), dtype=jnp.float32)
    targets = jax.random.randint(k_t, (2, 16, 16), 0, 4, dtype=jnp.int32)
    check(inputs, targets, 4)

    # Case 2: C_emb != num_classes, ragged spatial size (13*13 = 169) — single
    # ragged tile exercises the in-kernel lane-validity masking (no host pad).
    k_x, k_t, key = jax.random.split(key, 3)
    inputs2 = jax.random.normal(k_x, (2, 8, 13, 13), dtype=jnp.float32)
    targets2 = jax.random.randint(k_t, (2, 13, 13), 0, 5, dtype=jnp.int32)
    check(inputs2, targets2, 5)

    # Case 3: forced small tile -> multiple full tiles, exercises the parallel
    # spatial-chunk axis (megacore path) with rem == 0.
    k_x, k_t, key = jax.random.split(key, 3)
    inputs3 = jax.random.normal(k_x, (1, 8, 16, 16), dtype=jnp.float32)
    targets3 = jax.random.randint(k_t, (1, 16, 16), 0, 3, dtype=jnp.int32)
    check(inputs3, targets3, 3, tile_hw=128)

    # Case 4: forced small tile + ragged last tile + chunk axis together.
    k_x, k_t, key = jax.random.split(key, 3)
    inputs4 = jax.random.normal(k_x, (1, 4, 13, 13), dtype=jnp.float32)
    targets4 = jax.random.randint(k_t, (1, 13, 13), 0, 4, dtype=jnp.int32)
    check(inputs4, targets4, 4, tile_hw=128)

    print("KERNEL_OK")
</pallas_src>

<mosaic_0001>
module attributes {stable_mosaic.version = 11 : i64} {
  func.func @_center_sums_kernel(%arg0: i32, %arg1: i32, %arg2: i32, %arg3: memref<1x4x256xf32, #tpu.memory_space<vmem>>, %arg4: memref<1x1x256xi32, #tpu.memory_space<vmem>>, %arg5: memref<1x1x4x4xf32, #tpu.memory_space<vmem>>, %arg6: memref<1x1x4x1xf32, #tpu.memory_space<vmem>>) attributes {dimension_semantics = [#tpu.dimension_semantics<parallel>, #tpu.dimension_semantics<parallel>, #tpu.dimension_semantics<arbitrary>], iteration_bounds = array<i64: 2, 1, 1>, scalar_prefetch = 0 : i64, scratch_operands = 0 : i64, tpu.core_type = #tpu.core_type<tc>, window_params = [{transform_indices = @transform_0, window_bounds = array<i64: 1, 4, 256>}, {transform_indices = @transform_1, window_bounds = array<i64: 1, 1, 256>}, {transform_indices = @transform_2, window_bounds = array<i64: 1, 1, 4, 4>}, {transform_indices = @transform_3, window_bounds = array<i64: 1, 1, 4, 1>}]} {
    %c0_i32 = arith.constant 0 : i32
    %0 = arith.cmpi eq, %arg2, %c0_i32 : i32
    %1 = arith.extui %0 : i1 to i32
    %c0_i32_0 = arith.constant 0 : i32
    %2 = arith.cmpi ne, %1, %c0_i32_0 : i32
    scf.if %2 {
      %cst_23 = arith.constant 0.000000e+00 : f32
      %29 = vector.broadcast %cst_23 : f32 to vector<1x1x4x4xf32>
      %c0_24 = arith.constant 0 : index
      %c0_25 = arith.constant 0 : index
      %c0_26 = arith.constant 0 : index
      %c0_27 = arith.constant 0 : index
      %30 = vector.load %arg5[%c0_24, %c0_25, %c0_26, %c0_27] : memref<1x1x4x4xf32, #tpu.memory_space<vmem>>, vector<1x1x4x4xf32>
      tpu.vector_store %arg5[%c0_24, %c0_25, %c0_26, %c0_27], %29 {strides = array<i32>} : memref<1x1x4x4xf32, #tpu.memory_space<vmem>>, vector<1x1x4x4xf32>,
      %cst_28 = arith.constant 0.000000e+00 : f32
      %31 = vector.broadcast %cst_28 : f32 to vector<1x1x4x1xf32>
      %c0_29 = arith.constant 0 : index
      %c0_30 = arith.constant 0 : index
      %c0_31 = arith.constant 0 : index
      %c0_32 = arith.constant 0 : index
      %32 = vector.load %arg6[%c0_29, %c0_30, %c0_31, %c0_32] : memref<1x1x4x1xf32, #tpu.memory_space<vmem>>, vector<1x1x4x1xf32>
      tpu.vector_store %arg6[%c0_29, %c0_30, %c0_31, %c0_32], %31 {strides = array<i32>} : memref<1x1x4x1xf32, #tpu.memory_space<vmem>>, vector<1x1x4x1xf32>,
    } else {
    }
    %c0 = arith.constant 0 : index
    %c0_1 = arith.constant 0 : index
    %c0_2 = arith.constant 0 : index
    %3 = vector.load %arg4[%c0, %c0_1, %c0_2] : memref<1x1x256xi32, #tpu.memory_space<vmem>>, vector<1x1x256xi32>
    %4 = vector.shape_cast %3 : vector<1x1x256xi32> to vector<1x256xi32>
    %5 = tpu.iota {dimensions = array<i32: 0>} : vector<4x256xi32>
    %6 = vector.broadcast %4 : vector<1x256xi32> to vector<4x256xi32>
    %7 = arith.cmpi eq, %6, %5 : vector<4x256xi32>
    %c0_3 = arith.constant 0 : index
    %c0_4 = arith.constant 0 : index
    %c0_5 = arith.constant 0 : index
    %8 = vector.load %arg3[%c0_3, %c0_4, %c0_5] : memref<1x4x256xf32, #tpu.memory_space<vmem>>, vector<1x4x256xf32>
    %9 = vector.shape_cast %8 : vector<1x4x256xf32> to vector<4x256xf32>
    %10 = arith.extui %7 : vector<4x256xi1> to vector<4x256xi32>
    %11 = arith.sitofp %10 : vector<4x256xi32> to vector<4x256xf32>
    %cst = arith.constant dense<0.000000e+00> : vector<4x4xf32>
    %12 = tpu.matmul %11, %9, %cst {dimension_numbers = #tpu.dot_dimension_numbers<[1], [1], [0], [0], [0, 0, 1, 0], [], []>} : vector<4x256xf32>, vector<4x256xf32>, vector<4x4xf32> -> vector<4x4xf32>
    %13 = arith.extui %7 : vector<4x256xi1> to vector<4x256xi32>
    %14 = arith.sitofp %13 : vector<4x256xi32> to vector<4x256xf32>
    %cst_6 = arith.constant dense<0.000000e+00> : vector<4xf32>
    %15 = vector.multi_reduction <add>, %14, %cst_6 [1] : vector<4x256xf32> to vector<4xf32>
    %16 = vector.shape_cast %15 : vector<4xf32> to vector<4x1xf32>
    %c0_7 = arith.constant 0 : index
    %c0_8 = arith.constant 0 : index
    %c0_9 = arith.constant 0 : index
    %c0_10 = arith.constant 0 : index
    %17 = vector.load %arg5[%c0_7, %c0_8, %c0_9, %c0_10] : memref<1x1x4x4xf32, #tpu.memory_space<vmem>>, vector<1x1x4x4xf32>
    %18 = vector.shape_cast %17 : vector<1x1x4x4xf32> to vector<4x4xf32>
    %19 = arith.addf %18, %12 : vector<4x4xf32>
    %c0_11 = arith.constant 0 : index
    %c0_12 = arith.constant 0 : index
    %c0_13 = arith.constant 0 : index
    %c0_14 = arith.constant 0 : index
    %20 = vector.load %arg5[%c0_11, %c0_12, %c0_13, %c0_14] : memref<1x1x4x4xf32, #tpu.memory_space<vmem>>, vector<1x1x4x4xf32>
    %21 = vector.shape_cast %20 : vector<1x1x4x4xf32> to vector<4x4xf32>
    %22 = vector.shape_cast %19 : vector<4x4xf32> to vector<1x1x4x4xf32>
    tpu.vector_store %arg5[%c0_11, %c0_12, %c0_13, %c0_14], %22 {strides = array<i32>} : memref<1x1x4x4xf32, #tpu.memory_space<vmem>>, vector<1x1x4x4xf32>,
    %c0_15 = arith.constant 0 : index
    %c0_16 = arith.constant 0 : index
    %c0_17 = arith.constant 0 : index
    %c0_18 = arith.constant 0 : index
    %23 = vector.load %arg6[%c0_15, %c0_16, %c0_17, %c0_18] : memref<1x1x4x1xf32, #tpu.memory_space<vmem>>, vector<1x1x4x1xf32>
    %24 = vector.shape_cast %23 : vector<1x1x4x1xf32> to vector<4x1xf32>
    %25 = arith.addf %24, %16 : vector<4x1xf32>
    %c0_19 = arith.constant 0 : index
    %c0_20 = arith.constant 0 : index
    %c0_21 = arith.constant 0 : index
    %c0_22 = arith.constant 0 : index
    %26 = vector.load %arg6[%c0_19, %c0_20, %c0_21, %c0_22] : memref<1x1x4x1xf32, #tpu.memory_space<vmem>>, vector<1x1x4x1xf32>
    %27 = vector.shape_cast %26 : vector<1x1x4x1xf32> to vector<4x1xf32>
    %28 = vector.shape_cast %25 : vector<4x1xf32> to vector<1x1x4x1xf32>
    tpu.vector_store %arg6[%c0_19, %c0_20, %c0_21, %c0_22], %28 {strides = array<i32>} : memref<1x1x4x1xf32, #tpu.memory_space<vmem>>, vector<1x1x4x1xf32>,
    return
  }
  func.func @transform_0(%arg0: i32, %arg1: i32, %arg2: i32) -> (i32, i32, i32) {
    %c1_i32 = arith.constant 1 : i32
    %0 = arith.muli %arg1, %c1_i32 : i32
    %1 = arith.addi %0, %arg2 : i32
    %c0_i32 = arith.constant 0 : i32
    %c0_i32_0 = arith.constant 0 : i32
    return %arg0, %c0_i32, %1 : i32, i32, i32
  }
  func.func @transform_1(%arg0: i32, %arg1: i32, %arg2: i32) -> (i32, i32, i32) {
    %c1_i32 = arith.constant 1 : i32
    %0 = arith.muli %arg1, %c1_i32 : i32
    %1 = arith.addi %0, %arg2 : i32
    %c0_i32 = arith.constant 0 : i32
    %c0_i32_0 = arith.constant 0 : i32
    return %arg0, %c0_i32, %1 : i32, i32, i32
  }
  func.func @transform_2(%arg0: i32, %arg1: i32, %arg2: i32) -> (i32, i32, i32, i32) {
    %c0_i32 = arith.constant 0 : i32
    %c0_i32_0 = arith.constant 0 : i32
    %c0_i32_1 = arith.constant 0 : i32
    return %arg0, %arg1, %c0_i32, %c0_i32_0 : i32, i32, i32, i32
  }
  func.func @transform_3(%arg0: i32, %arg1: i32, %arg2: i32) -> (i32, i32, i32, i32) {
    %c0_i32 = arith.constant 0 : i32
    %c0_i32_0 = arith.constant 0 : i32
    %c0_i32_1 = arith.constant 0 : i32
    return %arg0, %arg1, %c0_i32, %c0_i32_0 : i32, i32, i32, i32
  }
}

</mosaic_0001>

<bundles_post_ra>
// kernel: tpu_custom_call.1
= control target key start
LH: loop header
LB: loop body
LE: loop exit
PB: predicated region body
PF: predicated region fallthrough
CT: control target
= control target key end

     0   :  { %9 = vsyncpa [#allocation3], 0  ;;  %s1062_s0 = inlined_call_operand.hbm [shape: f32[2,4,256], index: 0, kind: input, shape index: {}]   ;;  %s1063_s1 = inlined_call_operand.hbm [shape: s32[2,1,256], index: 1, kind: input, shape index: {}]   ;;  %s1064_s2 = inlined_call_operand.hbm [shape: f32[2,1,4,4], index: 2, kind: output, shape index: {0}]   ;;  %s1065_s3 = inlined_call_operand.vmem [shape: f32[2,1,4,1], index: 3, kind: output, shape index: {1}]  }
   0x1   :  { %11 = vsyncpa [#allocation3 + $0x1], 0 }
   0x2   :  { %12 = vsyncpa [#allocation6], 0 }
   0x3   :  { %14 = vsyncpa [#allocation6 + $0x1], 0 }
   0x4   :  { %15 = vsyncpa [#allocation4], 0 }
   0x5   :  { %17 = vsyncpa [#allocation4 + $0x1], 0  ;;  %s833_s12 = smov 0   ;;  %s835_s13 = smov 0  }
   0x6   :  { %s837_s14 = smov 0   ;;  %s839_s15 = smov 0  }
   0x7   :  { %s841_s16 = smov 0   ;;  %s843_s17 = smov 0  }
   0x8 LB: > { %s565_s18 = sadd.s32 4294967295, %s806_s17   ;;  %s566_s19 = sadd.s32 4294967294, %s806_s17   ;;  %s806_s17 = sphi %s843_s17, %s23_s17   ;;  %s802_s16 = sphi %s841_s16, %s1085_s16   ;;  %s798_s15 = sphi %s839_s15, %s1084_s15   ;;  %s794_s14 = sphi %s837_s14, %s1083_s14   ;;  %s790_s13 = sphi %s835_s13, %s1082_s13   ;;  %s786_s12 = sphi %s833_s12, %s1081_s12  }
   0x9   : > { %s42_s20 = sadd.s32 1, %s802_s16  ;;  %s53_s21 = sadd.s32 1, %s794_s14 }
   0xa   : > { %p44_p0 = scmp.ge.s32.totalorder %s42_s20, 2  ;;  %p60_p1 = scmp.ne.s32.totalorder %s794_s14, %s790_s13 }
   0xb   : > { %p61_p2 = scmp.eq.s32.totalorder %s806_s17, 0  ;;  %p66_p3 = scmp.ne.s32.totalorder %s790_s13, %s786_s12 }
   0xc   : > { %s1087_s20 = smov (%p44_p0, %s42_s20), 0  ;;  %p67_p5 = scmp.eq.s32.totalorder %s565_s18, 0 }
   0xd   : > { %p874_p4 = por %p61_p2, %p60_p1  ;;  %s48_s23 = ssub.s32 %s802_s16, %s1087_s20 }
   0xe   : > { %p122_p6 = scmp.eq.s32.totalorder %s565_s18, 1  ;;  %p51_p7 = scmp.eq.s32.totalorder %s48_s23, 0 }
   0xf   : > { %p880_p8 = por %p67_p5, %p66_p3  ;;  %p128_p10 = scmp.eq.s32.totalorder %s566_s19, 1 }
  0x10   : > { %p884_p9 = por %p122_p6, %p60_p1  ;;  %p607_p13 = scmp.lt.s32.totalorder %s806_s17, 2 }
  0x11   : > { %s1069_s24 = scalar_select %p880_p8, 1, 0 }
  0x12   : > { %s1070_s25 = scalar_select %p884_p9, 1, 0 }
  0x13   : > { %s889_s26 = scalar_select %p51_p7, %s794_s14, %s53_s21  }
  0x14   : > { %p891_p11 = por %p128_p10, %p66_p3  ;;  %s898_s28 = sand.u32 1, %s794_s14  }
  0x15   : > { %s569_s29 = sshll.u32 %s898_s28, 3  ;;  %s588_s30 = sshll.u32 %s802_s16, 7 }
  0x16   : > { %s1071_s27 = scalar_select %p891_p11, 1, 0 }
  0x17   : > { %s905_s6 = scalar_lea.hbm %s1062_s0, %s588_s30  ;;  %s180_s7 = scalar_lea.vmem [#allocation2], %s569_s29 }
  0x18   : > { %s191_s8 = sshll.u32 %s180_s7, 4  ;;  %p911_p0 = pnand %p607_p13, %p874_p4  ;;  %s907_s8 = int_to_ptr.vmem [resolvable:$true] %s191_s8 }
  0x19   : > { %s177_s10 = scalar_lea.sflag [#allocation3], %s898_s28  ;;  %s660_s11 = scalar_lea.hbm %s905_s6, 128 }
  0x1a   : > { %p661_p3 = scmp.ne.s32.totalorder %s905_s6, %s660_s11  ;;  %p662_p5 = pneg %p911_p0 }
  0x1b   : > { %s665_s21 = scalar_lea.hbm %s1062_s0, 256  ;;  %p666_p4 = scmp.lt.u32.totalorder %s905_s6, %s1062_s0 }
  0x1c   : > { %p663_p6 = pnand %p662_p5, %p661_p3  ;;  %p667_p10 = scmp.lt.u32.totalorder %s665_s21, %s660_s11 }
  0x1d   : > { %p669_p12 = scmp.lt.u32.totalorder %s660_s11, %s905_s6 }
  0x1e   : > { %p664_p7 = pneg %p663_p6  ;;  %p668_p13 = por %p667_p10, %p666_p4 }
  0x20   : > { %p670_p1 = por %p669_p12, %p668_p13 }
  0x22   : > { %p671_p2 = pnand %p670_p1, %p664_p7 }
  0x24   : > { %674 = shalt.err (!%p671_p2)
}
  0x25   : > { %s675_s29 = scalar_lea.vmem %s907_s8, 128  ;;  %s808_s30 = smov [#allocation2]  }
  0x26   : > { %p676_p3 = scmp.ne.s32.totalorder %s907_s8, %s675_s29  ;;  %s680_s4 = sshll.u32 %s808_s30, 4  ;;  %s681_s4 = int_to_ptr.vmem [resolvable:$false] %s680_s4 }
  0x27   : > { %s682_s5 = scalar_lea.vmem %s681_s4, 256  ;;  %p683_p9 = scmp.lt.s32.totalorder %s907_s8, %s681_s4 }
  0x28   : > { %p678_p6 = pnand %p676_p3, %p662_p5  ;;  %p684_p4 = scmp.lt.s32.totalorder %s682_s5, %s675_s29 }
  0x2a   : > { %p679_p11 = pneg %p678_p6  ;;  %p685_p10 = por %p684_p4, %p683_p9 }
  0x2c   : > { %p686_p12 = pnand %p685_p10, %p679_p11 }
  0x2e   : > { %689 = shalt.err (!%p686_p12)
}
  0x2f   : > { %599 = dma.hbm_to_vmem [thread:$0]  (!%p911_p0), %s905_s6, 128, %s907_s8, %s177_s10  }
  0x30   : > { %p1073_p1 = scmp.lt.s32.totalorder %s806_s17, 3  ;;  %p1074_p2 = scmp.ge.s32.totalorder %s806_s17, 1 }
  0x31   : > { %s572_s11 = sshll.u32 %s898_s28, 1  ;;  %s589_s18 = sshll.u32 %s802_s16, 5 }
  0x32   : > { %p947_p7 = pnand %p1074_p2, %p1073_p1  ;;  %s956_s22 = scalar_lea.hbm %s1063_s1, %s589_s18 }
  0x33   : > { %s202_s23 = scalar_lea.vmem [#allocation5], %s572_s11  ;;  %s199_s6 = scalar_lea.sflag [#allocation6], %s898_s28 }
  0x34   : > { %s1075_s7 = scalar_select %p947_p7, 1, 0 }
  0x35   : > { %s213_s29 = sshll.u32 %s202_s23, 4  ;;  %s690_s8 = scalar_lea.hbm %s956_s22, 32  ;;  %s214_s29 = int_to_ptr.vmem [resolvable:$true] %s213_s29 }
  0x36   : > { %p691_p9 = scmp.ne.s32.totalorder %s956_s22, %s690_s8  ;;  %s695_s4 = scalar_lea.hbm %s1063_s1, 64 }
  0x37   : > { %p696_p3 = scmp.lt.u32.totalorder %s956_s22, %s1063_s1  ;;  %p697_p6 = scmp.lt.u32.totalorder %s695_s4, %s690_s8 }
  0x38   : > { %p693_p11 = pnand %p691_p9, %p662_p5  ;;  %p699_p10 = scmp.lt.u32.totalorder %s690_s8, %s956_s22 }
  0x39   : > { %p698_p4 = por %p697_p6, %p696_p3 }
  0x3a   : > { %p694_p13 = pneg %p693_p11 }
  0x3b   : > { %p700_p12 = por %p699_p10, %p698_p4 }
  0x3d   : > { %p701_p1 = pnand %p700_p12, %p694_p13 }
  0x3f   : > { %704 = shalt.err (!%p701_p1)
}
  0x40   : > { %s705_s28 = scalar_lea.vmem %s214_s29, 32  ;;  %s809_s11 = smov [#allocation5]  }
  0x41   : > { %p706_p2 = scmp.ne.s32.totalorder %s214_s29, %s705_s28  ;;  %s710_s19 = sshll.u32 %s809_s11, 4  ;;  %s711_s19 = int_to_ptr.vmem [resolvable:$false] %s710_s19 }
  0x42   : > { %s712_s21 = scalar_lea.vmem %s711_s19, 64  ;;  %p713_p8 = scmp.lt.s32.totalorder %s214_s29, %s711_s19 }
  0x43   : > { %p708_p9 = pnand %p706_p2, %p662_p5  ;;  %p714_p7 = scmp.lt.s32.totalorder %s712_s21, %s705_s28 }
  0x45   : > { %p709_p11 = pneg %p708_p9  ;;  %p715_p3 = por %p714_p7, %p713_p8 }
  0x47   : > { %p716_p6 = pnand %p715_p3, %p709_p11 }
  0x49   : > { %719 = shalt.err (!%p716_p6)
}
  0x4a   : > { %602 = dma.hbm_to_vmem [thread:$0]  (!%p911_p0), %s956_s22, 32, %s214_s29, %s199_s6  }
  0x4b   : > { %p1076_p13 = scmp.ne.s32.totalorder %s1075_s7, 0 }
  0x4c   : > { %s981_s23 = sand.u32 (!%p1076_p13), 1, %s790_s13   ;;  %p1077_p5 = scmp.ne.s32.totalorder (!%p1076_p13), %s1069_s24, 0 }
  0x4d   : > { %222 = sbr.rel (%p1076_p13) target bundleno = 326 (0x146), region = 28  ;;  %s576_s8 = sshll.u32 (!%p1076_p13), %s981_s23, 3 }
  0x4e   : > { %s225_s10 = scalar_lea.sflag (!%p1076_p13), [#allocation3], %s981_s23  ;;  %s228_s30 = scalar_lea.vmem (!%p1076_p13), [#allocation2], %s576_s8 }
  0x54   : > { %773 = dma.done.wait (%p1077_p5), %s225_s10, 128  }
  0x55   : > { %775 = vsyncadd (%p1077_p5), %s225_s10, 4294967168  ;;  %s577_s9 = sshll.u32 %s981_s23, 1  ;;  %s234_s7 = scalar_lea.sflag [#allocation6], %s981_s23 }
  0x56   : > { %s237_s22 = scalar_lea.vmem [#allocation5], %s577_s9 }
  0x57   : > { %777 = dma.done.wait (%p1077_p5), %s234_s7, 32  }
  0x58   : > { %779 = vsyncadd (%p1077_p5), %s234_s7, 4294967264  ;;  %v292_v0 = vlaneseq  ;;  %s578_s29 = sshll.u32 %s981_s23, 2  ;;  %vm287_vm0 = vcmask 27648   ;;  %v810_v2 = vmov 0.0   ;;  %v304_v5 = vld [vmem:[%s228_s30] sm:$0xff]  ;;  %vm382_vm1 = vcmask 1043456  }
  0x59   : > { %s996_s6 = scalar_lea.vmem [#allocation7], %s578_s29  ;;  %v291_v6 = vld [vmem:[%s237_s22] sm:$0x3]  ;;  %v310_v7 = vcombine.high %v304_v5, %v304_v5  ;;  %v811_v11 = vmov 1.0   ;;  %p276_p8 = scmp.lt.s32.totalorder %s798_s15, 1  ;;  %vm289_vm4 = vcmask 3072  }
  0x5a   : > { %v293_v1 = vshrl.u32 %v292_v0, 7  ;;  %288 = vst.msk [vmem:[%s996_s6] sm:$0xf] %vm287_vm0, %v810_v2  ;;  %s585_s11 = sshll.u32 %s798_s15, 6  ;;  %s418_s19 = sshll.u32 %s996_s6, 4  ;;  %s1013_s19 = int_to_ptr.vmem [resolvable:$true] %s418_s19 }
  0x5b   : > { %312 = vmatprep.subr.mxu0 %v310_v7  ;;  %s277_s24 = scalar_select %p276_p8, %s798_s15, 1 }
  0x5c   : > { %v296_v3 = vsub.s32 0, %v293_v1  ;;  %v300_v4 = vsub.s32 1, %v293_v1  ;;  %313 = vmatpush1.xpose.msra.mxu0 %v304_v5  ;;  %s1011_s10 = scalar_lea.hbm %s1064_s2, %s585_s11  ;;  %s397_s30 = scalar_lea.sflag [#allocation4], %s981_s23 }
  0x5d   : > { %s579_s4 = sshll.u32 %s277_s24, 2  ;;  %s720_s9 = scalar_lea.vmem %s1013_s19, 64 }
  0x5e   : > { %v297_v8 = vrot.slane %v291_v6, %v296_v3  ;;  %v301_v9 = vrot.slane %v291_v6, %v300_v4  ;;  %s282_s28 = scalar_lea.vmem %s1065_s3, %s579_s4  ;;  %p721_p0 = scmp.ne.s32.totalorder %s1013_s19, %s720_s9 }
  0x5f   : > { %290 = vst.msk [vmem:[%s282_s28] sm:$0xf] %vm289_vm4, %v810_v2  ;;  %p1078_p7 = scmp.ne.s32.totalorder %s1070_s25, 0  ;;  %s812_s15 = smov [#allocation7]  }
  0x60   : > { %vm303_vm2 = vcmp.eq.s32.totalorder %v301_v9, %v293_v1  ;;  %vm302_vm3 = vcmp.eq.s32.totalorder %v297_v8, %v293_v1  ;;  %s724_s7 = sshll.u32 %s812_s15, 4  ;;  %s725_s7 = int_to_ptr.vmem [resolvable:$false] %s724_s7 }
  0x61   : > { %v581_v10 = vsel %vm303_vm2, 1.0, %v810_v2  ;;  %582 = vmatprep.mubr.msk.f32.mxu0 %vm303_vm2, %v811_v11  ;;  %v580_v12 = vsel %vm302_vm3, 1.0, %v810_v2  ;;  %v388_v19 = vld [vmem:[%s996_s6] sm:$0xf]  ;;  %p722_p4 = pnand %p721_p0, %p1078_p7  ;;  %s726_s22 = scalar_lea.vmem %s725_s7, 128 }
  0x62   : > { %v383_v13 = vsel %vm382_vm1, %v580_v12, 0.0  ;;  %v384_v14 = vsel %vm382_vm1, %v581_v10, 0.0  ;;  %583 = vmatmul.mubr.msk.f32.vlgmr.msra.gmra.mrb[0].mxu0 %vm302_vm3, %v811_v11  ;;  %p727_p12 = scmp.lt.s32.totalorder %s1013_s19, %s725_s7  ;;  %p728_p1 = scmp.lt.s32.totalorder %s726_s22, %s720_s9 }
  0x63   : > { %v385_v15 = vadd.f32 %v384_v14, %v383_v13  ;;  %p723_p10 = pneg %p722_p4 }
  0x64   : > { %p729_p2 = por %p728_p1, %p727_p12 }
  0x65   : > { %386 = vadd.xlane.f32.xlu0 %v385_v15 }
  0x66   : > { %v392_v16 = vld [vmem:[%s282_s28] sm:$0xf]  ;;  %p730_p9 = pnand %p729_p2, %p723_p10 }
  0xf2   : > { %v387_v17 = vpop.xlane.xlu0 %386 }
  0xf3   : > { %v393_v18 = vadd.f32 %v392_v16, %v387_v17 }
  0xf5   : > { %395 = vst.msk [vmem:[%s282_s28] sm:$0xf] %vm289_vm4, %v393_v18 }
 0x135   : > { %v378_v20 = vpop.f32.mrb[0].mxu0 }
 0x136   : > { %v389_v21 = vadd.f32 %v388_v19, %v378_v20  ;;  %v380_v22 = vpop.f32.mrb[1].mxu0 }
 0x138   : > { %391 = vst.msk [vmem:[%s996_s6] sm:$0xf] %vm287_vm0, %v389_v21 }
 0x139   : > { %733 = shalt.err (!%p730_p9)
}
 0x13a   : > { %s734_s23 = scalar_lea.hbm %s1011_s10, 64  ;;  %s738_s24 = scalar_lea.hbm %s1064_s2, 128 }
 0x13b   : > { %p735_p11 = scmp.ne.s32.totalorder %s1011_s10, %s734_s23  ;;  %p739_p13 = scmp.lt.u32.totalorder %s1011_s10, %s1064_s2 }
 0x13c   : > { %p740_p5 = scmp.lt.u32.totalorder %s738_s24, %s734_s23  ;;  %p742_p0 = scmp.lt.u32.totalorder %s734_s23, %s1011_s10 }
 0x13d   : > { %p736_p3 = pnand %p735_p11, %p1078_p7 }
 0x13e   : > { %p741_p8 = por %p740_p5, %p739_p13 }
 0x13f   : > { %p737_p6 = pneg %p736_p3 }
 0x140   : > { %p743_p4 = por %p742_p0, %p741_p8 }
 0x142   : > { %p744_p10 = pnand %p743_p4, %p737_p6 }
 0x144   : > { %747 = shalt.err (!%p744_p10)
}
 0x145   : > { %594 = dma.vmem_to_hbm [thread:$0]  (%p1078_p7), %s1013_s19, 64, %s1011_s10, %s397_s30  }
 0x146 PF: > { %s433_s18 = sand.u32 1, %s786_s12   ;;  %p1079_p12 = scmp.ne.s32.totalorder %s1071_s27, 0 }
 0x147   : > { %p1080_p1 = scmp.ge.s32.totalorder %s806_s17, 2  ;;  %s434_s28 = scalar_lea.sflag [#allocation4], %s433_s18 }
 0x149   : > { %p604_p2 = pnand %p1080_p1, %p1079_p12 }
 0x14b   : > { %781 = dma.done.wait (!%p604_p2), %s434_s28, 64  }
 0x14c   : > { %783 = vsyncadd (!%p604_p2), %s434_s28, 4294967232  ;;  %s23_s17 = sadd.s32 1, %s806_s17   ;;  %s1081_s12 = smov %s790_s13 }
 0x14d   : > { %p20_p9 = scmp.ge.s32.totalorder %s23_s17, 4   ;;  %s1082_s13 = smov %s794_s14 }
 0x14e   : > { %s1083_s14 = smov %s889_s26  ;;  %s1084_s15 = smov %s802_s16 }
 0x14f   : > { %s1085_s16 = smov %s1087_s20  ;;  %22 = sbr.rel (!%p20_p9) target bundleno = 8 (0x8), region = 102 }
 0x156   :  { %449 = vsyncpa [#allocation3], 1 }
 0x157   :  { %451 = vsyncpa [#allocation3 + $0x1], 1 }
 0x158   :  { %452 = vsyncpa [#allocation6], 1 }
 0x159   :  { %454 = vsyncpa [#allocation6 + $0x1], 1 }
 0x15a   :  { %455 = vsyncpa [#allocation4], 1 }
 0x15b   :  { %457 = vsyncpa [#allocation4 + $0x1], 1 }

</bundles_post_ra>
